<compile_context>
chip_gen: v7x
topology: tpu7x:2x2x1
jax: 0.10.0
libtpu: 0.0.40
codegen_flags: <defaults>
</compile_context>

<pallas_src>
import functools

import jax
import jax.numpy as jnp
from jax import lax
from jax.experimental import pallas as pl
from jax.experimental.pallas import tpu as pltpu


def get_kernel_size_and_padding(input_size):
    # GaborFilter.get_kernel_size_and_padding, one_kernel_per_feature=True branch
    offset = (input_size + 1) % 2
    nk = input_size + offset
    pad = (nk - 1) // 2
    return nk, pad


def _gauss_filter_kernel(pp_ref, supp_ref, x_ref, out_ref, xpad_ref, w_ref,
                         *, L, nk, nk_pad, pad, unroll):
    """One (channel, batch-tile) grid step.

    pp_ref   : SMEM (C, 4)            per-channel [mu, exp(-sigma), bn_scale, bn_shift]
    supp_ref : VMEM (nk, 1)           REVERSED kernel support (torch .flip(1))
    x_ref    : VMEM (L, Bb)           unpadded input tile (time on sublanes, batch on lanes)
    out_ref  : VMEM (L, Bb)           output tile
    xpad_ref : VMEM (L+nk_pad-1, Bb)  halo scratch (zero pads built in-kernel)
    w_ref    : VMEM (nk_pad, Bb)      Gaussian taps, lane-broadcast, zero beyond nk
    """
    c = pl.program_id(0)
    bb = out_ref.shape[-1]

    # Per-channel scalars from SMEM.
    mu = pp_ref[c, 0]
    inv_sigma = pp_ref[c, 1]     # exp(-sigma), precomputed on host
    scale = pp_ref[c, 2]         # folded eval-mode BatchNorm scale
    shift = pp_ref[c, 3]         # folded eval-mode BatchNorm shift

    # Gaussian taps on the reversed support, BN scale folded in.  (nk, 1)
    z = (supp_ref[...] - mu) * inv_sigma
    w = jnp.exp(-0.5 * z * z) * scale
    w_ref[0:nk, :] = jnp.broadcast_to(w, (nk, bb))
    if nk_pad > nk:
        w_ref[nk:nk_pad, :] = jnp.zeros((nk_pad - nk, bb), jnp.float32)

    # In-kernel halo: zero bands + interior copy (no host-side padding).
    if pad > 0:
        xpad_ref[0:pad, :] = jnp.zeros((pad, bb), jnp.float32)
    tail = xpad_ref.shape[0] - (pad + L)
    if tail > 0:
        xpad_ref[pad + L:pad + L + tail, :] = jnp.zeros((tail, bb), jnp.float32)
    xpad_ref[pad:pad + L, :] = x_ref[...]

    # Shift-multiply-accumulate over taps, chunked fori_loop (bounded live ranges).
    out_ref[...] = jnp.zeros_like(out_ref)
    n_chunks = nk_pad // unroll

    def chunk(ci, carry):
        base = pl.multiple_of(ci * unroll, unroll)
        part = xpad_ref[pl.ds(base, L), :] * w_ref[pl.ds(base, 1), :]
        for u in range(1, unroll):
            part = part + (xpad_ref[pl.ds(base + u, L), :]
                           * w_ref[pl.ds(base + u, 1), :])
        out_ref[...] += part
        return carry

    lax.fori_loop(0, n_chunks, chunk, 0)

    out_ref[...] = out_ref[...] + shift


def init_params(key, no_features, input_time_len):
    """Mirror GaussFilter.init_params (one_kernel_per_feature=True, bn_type=1, eval)."""
    nk, _ = get_kernel_size_and_padding(input_time_len)
    support_range = max(nk / 2.0, 3.0)
    k_sig, k_mu = jax.random.split(key)
    return {
        "sigma": jax.random.normal(k_sig, (no_features,), jnp.float32) * 0.1,
        "mu": jax.random.normal(k_mu, (no_features,), jnp.float32)
        * 0.01 * support_range,
        "kernel_support": jnp.linspace(
            -support_range, support_range, nk, dtype=jnp.float32
        ),
        # BatchNorm1d at PyTorch defaults (eval): gamma=1, beta=0, mean=0, var=1
        "bn_gamma": jnp.ones((no_features,), jnp.float32),
        "bn_beta": jnp.zeros((no_features,), jnp.float32),
        "bn_mean": jnp.zeros((no_features,), jnp.float32),
        "bn_var": jnp.ones((no_features,), jnp.float32),
    }


def gauss_filter_forward(data, params, *, eps=1e-5):
    """data: (B, C, L) -> (B, C, L), matching GaussFilter.forward (eval mode)."""
    B, C, L = data.shape
    nk, pad = get_kernel_size_and_padding(L)

    U = 8                                   # tap-loop unroll (sublane-aligned)
    nk_pad = U * pl.cdiv(nk, U)
    xpad_len = L + nk_pad - 1

    # Eval-mode BatchNorm1d folded into per-channel scale/shift.
    bn_scale = params["bn_gamma"] / jnp.sqrt(params["bn_var"] + eps)
    bn_shift = params["bn_beta"] - params["bn_mean"] * bn_scale

    # (C, 4) scalar table -> SMEM once; NOT tiled over batch.
    chan_params = jnp.stack(
        [params["mu"], jnp.exp(-params["sigma"]), bn_scale, bn_shift], axis=1
    ).astype(jnp.float32)

    # Reversed support == torch kernel.flip(1) under conv1d cross-correlation.
    support_rev = params["kernel_support"][::-1].reshape(nk, 1).astype(jnp.float32)

    # Batch-lane tile size.  B < 128 -> full-dim block (allowed); otherwise a
    # multiple of 128 lanes, kept modest so tiles also fit v7x's 64 MiB VMEM.
    if B < 128:
        Bb = B
    elif B % 256 == 0:
        Bb = 256
    else:
        Bb = 128
    Bp = pl.cdiv(B, Bb) * Bb

    # Lane-dense layout: (C, L, B_padded) — time on sublanes, batch on lanes.
    x3 = jnp.transpose(data.astype(jnp.float32), (1, 2, 0))
    if Bp != B:
        x3 = jnp.pad(x3, ((0, 0), (0, 0), (0, Bp - B)))

    grid = (C, Bp // Bb)

    # Per-tile VMEM: x + out double-buffered + halo & tap scratch.
    tile_bytes = 4 * Bb * (2 * L + 2 * L + xpad_len + nk_pad)
    vmem_limit = int(min(48 * 1024 * 1024, max(16 * 1024 * 1024, 2 * tile_bytes)))

    out3 = pl.pallas_call(
        functools.partial(_gauss_filter_kernel, L=L, nk=nk, nk_pad=nk_pad,
                          pad=pad, unroll=U),
        out_shape=jax.ShapeDtypeStruct((C, L, Bp), jnp.float32),
        grid=grid,
        in_specs=[
            pl.BlockSpec(memory_space=pltpu.MemorySpace.SMEM),    # (C, 4) params
            pl.BlockSpec((nk, 1), lambda c, j: (0, 0)),           # reversed support
            pl.BlockSpec((None, L, Bb), lambda c, j: (c, 0, j)),  # x tile
        ],
        out_specs=pl.BlockSpec((None, L, Bb), lambda c, j: (c, 0, j)),
        scratch_shapes=[
            pltpu.VMEM((xpad_len, Bb), jnp.float32),   # in-kernel halo buffer
            pltpu.VMEM((nk_pad, Bb), jnp.float32),     # lane-broadcast taps
        ],
        compiler_params=pltpu.CompilerParams(
            dimension_semantics=("parallel", "parallel"),
            vmem_limit_bytes=vmem_limit,
        ),
    )(chan_params, support_rev, x3)

    return jnp.transpose(out3[:, :, :B], (2, 0, 1))   # (B, C, L)


if __name__ == "__main__":
    key = jax.random.PRNGKey(0)
    B, C, L = 2, 4, 16                      # batch, no_features, input_time_len
    k_data, k_par = jax.random.split(key)

    data = jax.random.normal(k_data, (B, C, L), jnp.float32)
    params = init_params(k_par, C, L)

    out = jax.block_until_ready(gauss_filter_forward(data, params))
    assert out.shape == (B, C, L), out.shape
    assert bool(jnp.all(jnp.isfinite(out)))

    # pure-JAX reference: PyTorch conv1d == cross-correlation with flipped kernel
    nk, pad = get_kernel_size_and_padding(L)
    mu = params["mu"][:, None]
    sig = params["sigma"][:, None]
    gauss = jnp.exp(
        -0.5 * jnp.square((params["kernel_support"][None, :] - mu) / jnp.exp(sig))
    )
    w_flipped = gauss[:, ::-1][:, None, :]                   # (C, 1, nk)
    ref = lax.conv_general_dilated(
        data, w_flipped,
        window_strides=(1,), padding=[(pad, pad)],
        dimension_numbers=("NCH", "OIH", "NCH"),
        feature_group_count=C,
    )
    bn_scale = params["bn_gamma"] / jnp.sqrt(params["bn_var"] + 1e-5)
    bn_shift = params["bn_beta"] - params["bn_mean"] * bn_scale
    ref = ref * bn_scale[None, :, None] + bn_shift[None, :, None]
    err = float(jnp.max(jnp.abs(out - ref)))
    assert err < 1e-4, err

    print("KERNEL_OK")
</pallas_src>

<mosaic_0001>
module attributes {stable_mosaic.version = 11 : i64} {
  func.func @_gauss_filter_kernel(%arg0: i32, %arg1: i32, %arg2: memref<4x4xf32, #tpu.memory_space<smem>>, %arg3: memref<17x1xf32, #tpu.memory_space<vmem>>, %arg4: memref<1x16x2xf32, #tpu.memory_space<vmem>>, %arg5: memref<1x16x2xf32, #tpu.memory_space<vmem>>, %arg6: memref<39x2xf32, #tpu.memory_space<vmem>>, %arg7: memref<24x2xf32, #tpu.memory_space<vmem>>) attributes {dimension_semantics = [#tpu.dimension_semantics<parallel>, #tpu.dimension_semantics<parallel>], iteration_bounds = array<i64: 4, 1>, scalar_prefetch = 0 : i64, scratch_operands = 2 : i64, tpu.core_type = #tpu.core_type<tc>, window_params = [{transform_indices = @transform_0, window_bounds = array<i64: 4, 4>}, {pipeline_mode = #tpu.pipeline_mode<synchronous>, transform_indices = @transform_1, window_bounds = array<i64: 17, 1>}, {transform_indices = @transform_2, window_bounds = array<i64: 1, 16, 2>}, {transform_indices = @transform_3, window_bounds = array<i64: 1, 16, 2>}]} {
    %0 = arith.index_cast %arg0 : i32 to index
    %c0 = arith.constant 0 : index
    %1 = memref.load %arg2[%0, %c0] : memref<4x4xf32, #tpu.memory_space<smem>>
    %2 = arith.index_cast %arg0 : i32 to index
    %c1 = arith.constant 1 : index
    %3 = memref.load %arg2[%2, %c1] : memref<4x4xf32, #tpu.memory_space<smem>>
    %4 = arith.index_cast %arg0 : i32 to index
    %c2 = arith.constant 2 : index
    %5 = memref.load %arg2[%4, %c2] : memref<4x4xf32, #tpu.memory_space<smem>>
    %6 = arith.index_cast %arg0 : i32 to index
    %c3 = arith.constant 3 : index
    %7 = memref.load %arg2[%6, %c3] : memref<4x4xf32, #tpu.memory_space<smem>>
    %c0_0 = arith.constant 0 : index
    %c0_1 = arith.constant 0 : index
    %8 = vector.load %arg3[%c0_0, %c0_1] : memref<17x1xf32, #tpu.memory_space<vmem>>, vector<17x1xf32>
    %9 = vector.broadcast %1 : f32 to vector<17x1xf32>
    %10 = arith.subf %8, %9 : vector<17x1xf32>
    %11 = vector.broadcast %3 : f32 to vector<17x1xf32>
    %12 = arith.mulf %10, %11 : vector<17x1xf32>
    %cst = arith.constant -5.000000e-01 : f32
    %13 = vector.broadcast %cst : f32 to vector<17x1xf32>
    %14 = arith.mulf %13, %12 : vector<17x1xf32>
    %15 = arith.mulf %14, %12 : vector<17x1xf32>
    %16 = math.exp %15 : vector<17x1xf32>
    %17 = vector.broadcast %5 : f32 to vector<17x1xf32>
    %18 = arith.mulf %16, %17 : vector<17x1xf32>
    %19 = vector.shape_cast %18 : vector<17x1xf32> to vector<17x1xf32>
    %20 = vector.broadcast %19 : vector<17x1xf32> to vector<17x2xf32>
    %c0_2 = arith.constant 0 : index
    %c0_3 = arith.constant 0 : index
    %21 = vector.load %arg7[%c0_2, %c0_3] : memref<24x2xf32, #tpu.memory_space<vmem>>, vector<17x2xf32>
    tpu.vector_store %arg7[%c0_2, %c0_3], %20 {strides = array<i32>} : memref<24x2xf32, #tpu.memory_space<vmem>>, vector<17x2xf32>,
    %cst_4 = arith.constant 0.000000e+00 : f32
    %22 = vector.broadcast %cst_4 : f32 to vector<7x2xf32>
    %c17 = arith.constant 17 : index
    %c0_5 = arith.constant 0 : index
    %23 = vector.load %arg7[%c17, %c0_5] : memref<24x2xf32, #tpu.memory_space<vmem>>, vector<7x2xf32>
    tpu.vector_store %arg7[%c17, %c0_5], %22 {strides = array<i32>} : memref<24x2xf32, #tpu.memory_space<vmem>>, vector<7x2xf32>,
    %cst_6 = arith.constant 0.000000e+00 : f32
    %24 = vector.broadcast %cst_6 : f32 to vector<8x2xf32>
    %c0_7 = arith.constant 0 : index
    %c0_8 = arith.constant 0 : index
    %25 = vector.load %arg6[%c0_7, %c0_8] : memref<39x2xf32, #tpu.memory_space<vmem>>, vector<8x2xf32>
    tpu.vector_store %arg6[%c0_7, %c0_8], %24 {strides = array<i32>} : memref<39x2xf32, #tpu.memory_space<vmem>>, vector<8x2xf32>,
    %cst_9 = arith.constant 0.000000e+00 : f32
    %26 = vector.broadcast %cst_9 : f32 to vector<15x2xf32>
    %c24 = arith.constant 24 : index
    %c0_10 = arith.constant 0 : index
    %27 = vector.load %arg6[%c24, %c0_10] : memref<39x2xf32, #tpu.memory_space<vmem>>, vector<15x2xf32>
    tpu.vector_store %arg6[%c24, %c0_10], %26 {strides = array<i32>} : memref<39x2xf32, #tpu.memory_space<vmem>>, vector<15x2xf32>,
    %c0_11 = arith.constant 0 : index
    %c0_12 = arith.constant 0 : index
    %c0_13 = arith.constant 0 : index
    %28 = vector.load %arg4[%c0_11, %c0_12, %c0_13] : memref<1x16x2xf32, #tpu.memory_space<vmem>>, vector<1x16x2xf32>
    %29 = vector.shape_cast %28 : vector<1x16x2xf32> to vector<16x2xf32>
    %c8 = arith.constant 8 : index
    %c0_14 = arith.constant 0 : index
    %30 = vector.load %arg6[%c8, %c0_14] : memref<39x2xf32, #tpu.memory_space<vmem>>, vector<16x2xf32>
    tpu.vector_store %arg6[%c8, %c0_14], %29 {strides = array<i32>} : memref<39x2xf32, #tpu.memory_space<vmem>>, vector<16x2xf32>,
    %cst_15 = arith.constant 0.000000e+00 : f32
    %31 = vector.broadcast %cst_15 : f32 to vector<16x2xf32>
    %c0_16 = arith.constant 0 : index
    %c0_17 = arith.constant 0 : index
    %c0_18 = arith.constant 0 : index
    %32 = vector.load %arg5[%c0_16, %c0_17, %c0_18] : memref<1x16x2xf32, #tpu.memory_space<vmem>>, vector<1x16x2xf32>
    %33 = vector.shape_cast %32 : vector<1x16x2xf32> to vector<16x2xf32>
    %34 = vector.shape_cast %31 : vector<16x2xf32> to vector<1x16x2xf32>
    tpu.vector_store %arg5[%c0_16, %c0_17, %c0_18], %34 {strides = array<i32>} : memref<1x16x2xf32, #tpu.memory_space<vmem>>, vector<1x16x2xf32>,
    %c0_i32 = arith.constant 0 : i32
    %c3_i32 = arith.constant 3 : i32
    %35 = arith.addi %c0_i32, %c3_i32 : i32
    %c1_i32 = arith.constant 1 : i32
    scf.for %arg8 = %c0_i32 to %35 step %c1_i32  : i32 {
      %c8_i32 = arith.constant 8 : i32
      %43 = arith.muli %arg8, %c8_i32 : i32
      %44 = tpu.assume_multiple %43, 8 : i32
      %45 = arith.index_cast %44 : i32 to index
      %c0_26 = arith.constant 0 : index
      %46 = vector.load %arg6[%45, %c0_26] : memref<39x2xf32, #tpu.memory_space<vmem>>, vector<16x2xf32>
      %47 = arith.index_cast %44 : i32 to index
      %c0_27 = arith.constant 0 : index
      %48 = vector.load %arg7[%47, %c0_27] : memref<24x2xf32, #tpu.memory_space<vmem>>, vector<1x2xf32>
      %49 = vector.broadcast %48 : vector<1x2xf32> to vector<16x2xf32>
      %50 = arith.mulf %46, %49 : vector<16x2xf32>
      %c1_i32_28 = arith.constant 1 : i32
      %51 = arith.addi %44, %c1_i32_28 : i32
      %52 = arith.index_cast %51 : i32 to index
      %c0_29 = arith.constant 0 : index
      %53 = vector.load %arg6[%52, %c0_29] : memref<39x2xf32, #tpu.memory_space<vmem>>, vector<16x2xf32>
      %c1_i32_30 = arith.constant 1 : i32
      %54 = arith.addi %44, %c1_i32_30 : i32
      %55 = arith.index_cast %54 : i32 to index
      %c0_31 = arith.constant 0 : index
      %56 = vector.load %arg7[%55, %c0_31] : memref<24x2xf32, #tpu.memory_space<vmem>>, vector<1x2xf32>
      %57 = vector.broadcast %56 : vector<1x2xf32> to vector<16x2xf32>
      %58 = arith.mulf %53, %57 : vector<16x2xf32>
      %59 = arith.addf %50, %58 : vector<16x2xf32>
      %c2_i32 = arith.constant 2 : i32
      %60 = arith.addi %44, %c2_i32 : i32
      %61 = arith.index_cast %60 : i32 to index
      %c0_32 = arith.constant 0 : index
      %62 = vector.load %arg6[%61, %c0_32] : memref<39x2xf32, #tpu.memory_space<vmem>>, vector<16x2xf32>
      %c2_i32_33 = arith.constant 2 : i32
      %63 = arith.addi %44, %c2_i32_33 : i32
      %64 = arith.index_cast %63 : i32 to index
      %c0_34 = arith.constant 0 : index
      %65 = vector.load %arg7[%64, %c0_34] : memref<24x2xf32, #tpu.memory_space<vmem>>, vector<1x2xf32>
      %66 = vector.broadcast %65 : vector<1x2xf32> to vector<16x2xf32>
      %67 = arith.mulf %62, %66 : vector<16x2xf32>
      %68 = arith.addf %59, %67 : vector<16x2xf32>
      %c3_i32_35 = arith.constant 3 : i32
      %69 = arith.addi %44, %c3_i32_35 : i32
      %70 = arith.index_cast %69 : i32 to index
      %c0_36 = arith.constant 0 : index
      %71 = vector.load %arg6[%70, %c0_36] : memref<39x2xf32, #tpu.memory_space<vmem>>, vector<16x2xf32>
      %c3_i32_37 = arith.constant 3 : i32
      %72 = arith.addi %44, %c3_i32_37 : i32
      %73 = arith.index_cast %72 : i32 to index
      %c0_38 = arith.constant 0 : index
      %74 = vector.load %arg7[%73, %c0_38] : memref<24x2xf32, #tpu.memory_space<vmem>>, vector<1x2xf32>
      %75 = vector.broadcast %74 : vector<1x2xf32> to vector<16x2xf32>
      %76 = arith.mulf %71, %75 : vector<16x2xf32>
      %77 = arith.addf %68, %76 : vector<16x2xf32>
      %c4_i32 = arith.constant 4 : i32
      %78 = arith.addi %44, %c4_i32 : i32
      %79 = arith.index_cast %78 : i32 to index
      %c0_39 = arith.constant 0 : index
      %80 = vector.load %arg6[%79, %c0_39] : memref<39x2xf32, #tpu.memory_space<vmem>>, vector<16x2xf32>
      %c4_i32_40 = arith.constant 4 : i32
      %81 = arith.addi %44, %c4_i32_40 : i32
      %82 = arith.index_cast %81 : i32 to index
      %c0_41 = arith.constant 0 : index
      %83 = vector.load %arg7[%82, %c0_41] : memref<24x2xf32, #tpu.memory_space<vmem>>, vector<1x2xf32>
      %84 = vector.broadcast %83 : vector<1x2xf32> to vector<16x2xf32>
      %85 = arith.mulf %80, %84 : vector<16x2xf32>
      %86 = arith.addf %77, %85 : vector<16x2xf32>
      %c5_i32 = arith.constant 5 : i32
      %87 = arith.addi %44, %c5_i32 : i32
      %88 = arith.index_cast %87 : i32 to index
      %c0_42 = arith.constant 0 : index
      %89 = vector.load %arg6[%88, %c0_42] : memref<39x2xf32, #tpu.memory_space<vmem>>, vector<16x2xf32>
      %c5_i32_43 = arith.constant 5 : i32
      %90 = arith.addi %44, %c5_i32_43 : i32
      %91 = arith.index_cast %90 : i32 to index
      %c0_44 = arith.constant 0 : index
      %92 = vector.load %arg7[%91, %c0_44] : memref<24x2xf32, #tpu.memory_space<vmem>>, vector<1x2xf32>
      %93 = vector.broadcast %92 : vector<1x2xf32> to vector<16x2xf32>
      %94 = arith.mulf %89, %93 : vector<16x2xf32>
      %95 = arith.addf %86, %94 : vector<16x2xf32>
      %c6_i32 = arith.constant 6 : i32
      %96 = arith.addi %44, %c6_i32 : i32
      %97 = arith.index_cast %96 : i32 to index
      %c0_45 = arith.constant 0 : index
      %98 = vector.load %arg6[%97, %c0_45] : memref<39x2xf32, #tpu.memory_space<vmem>>, vector<16x2xf32>
      %c6_i32_46 = arith.constant 6 : i32
      %99 = arith.addi %44, %c6_i32_46 : i32
      %100 = arith.index_cast %99 : i32 to index
      %c0_47 = arith.constant 0 : index
      %101 = vector.load %arg7[%100, %c0_47] : memref<24x2xf32, #tpu.memory_space<vmem>>, vector<1x2xf32>
      %102 = vector.broadcast %101 : vector<1x2xf32> to vector<16x2xf32>
      %103 = arith.mulf %98, %102 : vector<16x2xf32>
      %104 = arith.addf %95, %103 : vector<16x2xf32>
      %c7_i32 = arith.constant 7 : i32
      %105 = arith.addi %44, %c7_i32 : i32
      %106 = arith.index_cast %105 : i32 to index
      %c0_48 = arith.constant 0 : index
      %107 = vector.load %arg6[%106, %c0_48] : memref<39x2xf32, #tpu.memory_space<vmem>>, vector<16x2xf32>
      %c7_i32_49 = arith.constant 7 : i32
      %108 = arith.addi %44, %c7_i32_49 : i32
      %109 = arith.index_cast %108 : i32 to index
      %c0_50 = arith.constant 0 : index
      %110 = vector.load %arg7[%109, %c0_50] : memref<24x2xf32, #tpu.memory_space<vmem>>, vector<1x2xf32>
      %111 = vector.broadcast %110 : vector<1x2xf32> to vector<16x2xf32>
      %112 = arith.mulf %107, %111 : vector<16x2xf32>
      %113 = arith.addf %104, %112 : vector<16x2xf32>
      %c0_51 = arith.constant 0 : index
      %c0_52 = arith.constant 0 : index
      %c0_53 = arith.constant 0 : index
      %114 = vector.load %arg5[%c0_51, %c0_52, %c0_53] : memref<1x16x2xf32, #tpu.memory_space<vmem>>, vector<1x16x2xf32>
      %115 = vector.shape_cast %114 : vector<1x16x2xf32> to vector<16x2xf32>
      %116 = arith.addf %115, %113 : vector<16x2xf32>
      %c0_54 = arith.constant 0 : index
      %c0_55 = arith.constant 0 : index
      %c0_56 = arith.constant 0 : index
      %117 = vector.load %arg5[%c0_54, %c0_55, %c0_56] : memref<1x16x2xf32, #tpu.memory_space<vmem>>, vector<1x16x2xf32>
      %118 = vector.shape_cast %117 : vector<1x16x2xf32> to vector<16x2xf32>
      %119 = vector.shape_cast %116 : vector<16x2xf32> to vector<1x16x2xf32>
      tpu.vector_store %arg5[%c0_54, %c0_55, %c0_56], %119 {strides = array<i32>} : memref<1x16x2xf32, #tpu.memory_space<vmem>>, vector<1x16x2xf32>,
    }
    %c3_i32_19 = arith.constant 3 : i32
    %c0_20 = arith.constant 0 : index
    %c0_21 = arith.constant 0 : index
    %c0_22 = arith.constant 0 : index
    %36 = vector.load %arg5[%c0_20, %c0_21, %c0_22] : memref<1x16x2xf32, #tpu.memory_space<vmem>>, vector<1x16x2xf32>
    %37 = vector.shape_cast %36 : vector<1x16x2xf32> to vector<16x2xf32>
    %38 = vector.broadcast %7 : f32 to vector<16x2xf32>
    %39 = arith.addf %37, %38 : vector<16x2xf32>
    %c0_23 = arith.constant 0 : index
    %c0_24 = arith.constant 0 : index
    %c0_25 = arith.constant 0 : index
    %40 = vector.load %arg5[%c0_23, %c0_24, %c0_25] : memref<1x16x2xf32, #tpu.memory_space<vmem>>, vector<1x16x2xf32>
    %41 = vector.shape_cast %40 : vector<1x16x2xf32> to vector<16x2xf32>
    %42 = vector.shape_cast %39 : vector<16x2xf32> to vector<1x16x2xf32>
    tpu.vector_store %arg5[%c0_23, %c0_24, %c0_25], %42 {strides = array<i32>} : memref<1x16x2xf32, #tpu.memory_space<vmem>>, vector<1x16x2xf32>,
    return
  }
  func.func @transform_0(%arg0: i32, %arg1: i32) -> (i32, i32) {
    %c0_i32 = arith.constant 0 : i32
    %c0_i32_0 = arith.constant 0 : i32
    %c0_i32_1 = arith.constant 0 : i32
    return %c0_i32, %c0_i32_0 : i32, i32
  }
  func.func @transform_1(%arg0: i32, %arg1: i32) -> (i32, i32) {
    %c0_i32 = arith.constant 0 : i32
    %c0_i32_0 = arith.constant 0 : i32
    %c0_i32_1 = arith.constant 0 : i32
    return %c0_i32, %c0_i32_0 : i32, i32
  }
  func.func @transform_2(%arg0: i32, %arg1: i32) -> (i32, i32, i32) {
    %c0_i32 = arith.constant 0 : i32
    %c0_i32_0 = arith.constant 0 : i32
    return %arg0, %c0_i32, %arg1 : i32, i32, i32
  }
  func.func @transform_3(%arg0: i32, %arg1: i32) -> (i32, i32, i32) {
    %c0_i32 = arith.constant 0 : i32
    %c0_i32_0 = arith.constant 0 : i32
    return %arg0, %c0_i32, %arg1 : i32, i32, i32
  }
}

</mosaic_0001>

<bundles_post_ra>
// kernel: tpu_custom_call.1
= control target key start
LH: loop header
LB: loop body
LE: loop exit
PB: predicated region body
PF: predicated region fallthrough
CT: control target
= control target key end

     0   :  { %8 = vsyncpa [#allocation5], 0  ;;  %s745_s12 = smov 0   ;;  %s747_s13 = smov 0   ;;  %s884_s0 = inlined_call_operand.vmem [shape: f32[4,4], index: 0, kind: input, shape index: {}]   ;;  %s885_s1 = inlined_call_operand.vmem [shape: f32[17,1], index: 1, kind: input, shape index: {}]   ;;  %s886_s2 = inlined_call_operand.vmem [shape: f32[4,16,2], index: 2, kind: input, shape index: {}]   ;;  %s887_s3 = inlined_call_operand.vmem [shape: f32[4,16,2], index: 3, kind: output, shape index: {}]  }
   0x1   :  { %s749_s14 = smov 0  }
   0x2 LB: > { %s558_s15 = sadd.s32 4294967295, %s716_s14   ;;  %s26_s16 = sadd.s32 1, %s712_s13  ;;  %s716_s14 = sphi %s749_s14, %s14_s14   ;;  %s712_s13 = sphi %s747_s13, %s891_s13   ;;  %s708_s12 = sphi %s745_s12, %s890_s12  }
   0x3   : > { %p28_p0 = scmp.ge.s32.totalorder %s26_s16, 4  ;;  %p560_p1 = scmp.ge.s32.totalorder %s716_s14, 1 }
   0x4   : > { %p129_p2 = scmp.lt.s32.totalorder %s716_s14, 5  ;;  %p770_p4 = scmp.eq.s32.totalorder %s558_s15, 0 }
   0x5   : > { %s893_s16 = smov (%p28_p0, %s26_s16), 0  ;;  %s142_s21 = sshll.u32 %s884_s0, 4  ;;  %s143_s21 = int_to_ptr.vmem [resolvable:$true] %s142_s21 }
   0x6   : > { %p766_p3 = pnand %p560_p1, %p129_p2  ;;  %s671_s22 = scalar_lea.vmem %s143_s21, 64 }
   0x7   : > { %p672_p7 = scmp.ne.s32.totalorder %s143_s21, %s671_s22  ;;  %p679_p11 = scmp.lt.s32.totalorder %s143_s21, %s143_s21 }
   0x8   : > { %p622_p5 = pneg %p766_p3  ;;  %p680_p12 = scmp.lt.s32.totalorder %s671_s22, %s671_s22 }
   0xa   : > { %p623_p6 = pnand %p770_p4, %p622_p5  ;;  %p681_p13 = por %p680_p12, %p679_p11 }
   0xc   : > { %p673_p8 = pneg %p623_p6 }
   0xe   : > { %p674_p9 = pnand %p673_p8, %p672_p7 }
  0x10   : > { %p675_p10 = pneg %p674_p9 }
  0x12   : > { %p682_p0 = pnand %p681_p13, %p675_p10 }
  0x14   : > { %685 = shalt.err (!%p682_p0)
}
  0x15   : > { %s722_s23 = smov [#allocation4]   ;;  %169 = sbr.rel (%p766_p3) target bundleno = 232 (0xe8), region = 32 }
  0x16   : > { %625 = dma.vmem_to_smem (!%p623_p6), %s143_s21, 64, %s722_s23, [#allocation5]  }
  0x1c   : > { %703 = dma.done.wait (%p770_p4), [#allocation5], 64  }
  0x1d   : > { %705 = vsyncadd (%p770_p4), [#allocation5], 4294967232 }
  0x1e   : > { %175 = sfence }
  0x1f   : > { %s788_s24 = sshll.u32 %s708_s12, 7  ;;  %v723_v0 = vmov 0   ;;  %vm266_vm0 = vcmask 15360   ;;  %vm271_vm1 = vcmask 14336   ;;  %v724_v1 = vmov 0.0   ;;  %v224_v2 = vld [vmem:[%s885_s1] sm:$0xff] }
  0x20   : > { %663 = vset.pattern.permute.xlu0 %v723_v0  ;;  %s217_s25 = sld [smem:[#allocation4 + %s788_s24]]  ;;  %s218_s26 = sadd.s32 1, %s788_s24  ;;  %664 = vset.pattern.permute.xlu1 %v723_v0  ;;  %272 = vst.msk [vmem:[#allocation3 + $0x11] sm:$0x7f] %vm271_vm1, %v724_v1  ;;  %275 = vst.msk [vmem:[#allocation2 + $0x20] sm:$0x7f] %vm271_vm1, %v724_v1 }
  0x21   : > { %s219_s27 = sld [smem:[#allocation4 + %s218_s26]]  ;;  %273 = vst.msk [vmem:[#allocation2] sm:$0xff] %vm266_vm0, %v724_v1  ;;  %274 = vst.msk [vmem:[#allocation2 + $0x18] sm:$0xff] %vm266_vm0, %v724_v1  ;;  %s222_s28 = sadd.s32 3, %s788_s24  ;;  %v225_v3 = vld [vmem:[%s885_s1 + $0x8] sm:$0xff]  ;;  %vm269_vm2 = vcmask 8192  }
  0x22   : > { %s795_s29 = sld [smem:[#allocation4 + %s222_s28]]  ;;  %v226_v4 = vld [vmem:[%s885_s1 + $0x10] sm:$0x1]  ;;  %s220_s9 = sadd.s32 2, %s788_s24 }
  0x23   : > { %s221_s10 = sld [smem:[#allocation4 + %s220_s9]]  ;;  %p200_p1 = scmp.lt.s32.totalorder %s708_s12, 3 }
  0x25   : > { %s895_s12 = smov (!%p200_p1, %s708_s12), 3 }
  0x26   : > { %v227_v5 = vstv %s217_s25  ;;  %s616_s11 = sshll.u32 %s895_s12, 4  ;;  %s825_s12 = smov 0  }
  0x27   : > { %v228_v6 = vsub.f32 %v224_v2, %v227_v5  ;;  %v229_v7 = vsub.f32 %v225_v3, %v227_v5  ;;  %v230_v8 = vsub.f32 %v226_v4, %v227_v5  ;;  %v231_v9 = vstv %s219_s27  ;;  %s207_s18 = scalar_lea.vmem %s886_s2, %s616_s11  ;;  %s815_s21 = scalar_lea.vmem %s887_s3, %s616_s11 }
  0x28   : > { %v276_v29 = vld [vmem:[%s207_s18] sm:$0xff]  ;;  %v277_v30 = vld [vmem:[%s207_s18 + $0x8] sm:$0xff]  ;;  %280 = vst.msk [vmem:[%s815_s21] sm:$0xff] %vm266_vm0, %v724_v1  ;;  %281 = vst.msk [vmem:[%s815_s21 + $0x8] sm:$0xff] %vm266_vm0, %v724_v1 }
  0x29   : > { %v232_v10 = vmul.f32 %v231_v9, %v228_v6  ;;  %v233_v11 = vmul.f32 %v231_v9, %v229_v7  ;;  %v234_v12 = vmul.f32 %v231_v9, %v230_v8  ;;  %v247_v22 = vstv %s221_s10  ;;  %278 = vst.msk [vmem:[#allocation2 + $0x8] sm:$0xff] %vm266_vm0, %v276_v29  ;;  %279 = vst.msk [vmem:[#allocation2 + $0x10] sm:$0xff] %vm266_vm0, %v277_v30 }
  0x2b   : > { %v235_v13 = vmul.f32 -0.5, %v232_v10  ;;  %v237_v14 = vmul.f32 -0.5, %v234_v12  ;;  %v236_v15 = vmul.f32 -0.5, %v233_v11 }
  0x2d   : > { %v238_v16 = vmul.f32 %v235_v13, %v232_v10  ;;  %v240_v17 = vmul.f32 %v237_v14, %v234_v12  ;;  %v239_v18 = vmul.f32 %v236_v15, %v233_v11 }
  0x2f   : > { %v241_v19 = vmul.f32 1.442695, %v238_v16  ;;  %v245_v20 = vmul.f32 1.442695, %v240_v17  ;;  %v243_v21 = vmul.f32 1.442695, %v239_v18 }
  0x31   : > { %665 = vpow2.f32 %v241_v19 }
  0x32   : > { %667 = vpow2.f32 %v245_v20 }
  0x33   : > { %669 = vpow2.f32 %v243_v21 }
  0x3b   : > { %v666_v23 = vpop.eup %665 }
  0x3c   : > { %v668_v24 = vpop.eup %667  ;;  %v248_v25 = vmul.f32 %v666_v23, %v247_v22 }
  0x3d   : > { %v670_v26 = vpop.eup %669  ;;  %v250_v27 = vmul.f32 %v668_v24, %v247_v22 }
  0x3e   : > { %253 = vperm.xlu0 %663, %v248_v25   ;;  %v249_v28 = vmul.f32 %v670_v26, %v247_v22 }
  0x3f   : > { %263 = vperm.xlu1 %664, %v250_v27  }
  0x42   : > { %258 = vperm.xlu0 %663, %v249_v28  }
  0xbd   : > { %v254_v31 = vpop.permute.xlu0 %253 }
  0xbe   : > { %267 = vst.msk [vmem:[#allocation3] sm:$0xff] %vm266_vm0, %v254_v31  ;;  %v264_v32 = vpop.permute.xlu1 %263 }
  0xbf   : > { %270 = vst.msk [vmem:[#allocation3 + $0x10] sm:$0x1] %vm269_vm2, %v264_v32 }
  0xc1   : > { %v259_v33 = vpop.permute.xlu0 %258 }
  0xc2   : > { %268 = vst.msk [vmem:[#allocation3 + $0x8] sm:$0xff] %vm266_vm0, %v259_v33 }
  0xc3 LB: >> { %s570_s22 = sshll.u32 %s720_s12, 3  ;;  %v398_v19 = vld [vmem:[%s815_s21] sm:$0xff]  ;;  %v399_v25 = vld [vmem:[%s815_s21 + $0x8] sm:$0xff]  ;;  %s287_s12 = sadd.s32 1, %s720_s12   ;;  %s720_s12 = sphi %s825_s12, %s287_s12  }
  0xc4   : >> { %s831_s23 = scalar_lea.vmem [#allocation2], %s570_s22  ;;  %s834_s24 = scalar_lea.vmem [#allocation3], %s570_s22 }
  0xc5   : >> { %v290_v34 = vld [vmem:[%s831_s23] sm:$0xff]  ;;  %v291_v51 = vld [vmem:[%s831_s23 + $0x8] sm:$0xff]  ;;  %p284_p2 = scmp.ge.s32.totalorder %s287_s12, 3  }
  0xc6   : >> { %v573_v36 = vld [vmem:[%s831_s23 + $0x1] sm:$0xff]  ;;  %v574_v52 = vld [vmem:[%s831_s23 + $0x9] sm:$0xff]  ;;  %v406_v29 = vstv (%p284_p2), %s795_s29 }
  0xc7   : >> { %v579_v39 = vld [vmem:[%s831_s23 + $0x2] sm:$0xff]  ;;  %v580_v57 = vld [vmem:[%s831_s23 + $0xa] sm:$0xff] }
  0xc8   : >> { %v585_v43 = vld [vmem:[%s831_s23 + $0x3] sm:$0xff]  ;;  %v586_v58 = vld [vmem:[%s831_s23 + $0xb] sm:$0xff] }
  0xc9   : >> { %v571_v35 = vld [vmem:[%s834_s24] ss:$0 sm:$0xff]  ;;  %v577_v38 = vld [vmem:[%s834_s24 + $0x1] ss:$0 sm:$0xff]  ;;  %v583_v40 = vld [vmem:[%s834_s24 + $0x2] ss:$0 sm:$0xff] }
  0xca   : >> { %v298_v37 = vmul.f32 %v571_v35, %v290_v34  ;;  %v310_v41 = vmul.f32 %v577_v38, %v573_v36  ;;  %v324_v42 = vmul.f32 %v583_v40, %v579_v39  ;;  %v589_v44 = vld [vmem:[%s834_s24 + $0x3] ss:$0 sm:$0xff]  ;;  %v591_v45 = vld [vmem:[%s831_s23 + $0x4] sm:$0xff]  ;;  %v299_v55 = vmul.f32 %v571_v35, %v291_v51  ;;  %v592_v62 = vld [vmem:[%s831_s23 + $0xc] sm:$0xff] }
  0xcb   : >> { %v595_v46 = vld [vmem:[%s834_s24 + $0x4] ss:$0 sm:$0xff]  ;;  %v338_v48 = vmul.f32 %v589_v44, %v585_v43  ;;  %v597_v49 = vld [vmem:[%s831_s23 + $0x5] sm:$0xff]  ;;  %v311_v56 = vmul.f32 %v577_v38, %v574_v52  ;;  %v325_v61 = vmul.f32 %v583_v40, %v580_v57  ;;  %v339_v2 = vmul.f32 %v589_v44, %v586_v58  ;;  %v598_v5 = vld [vmem:[%s831_s23 + $0xd] sm:$0xff] }
  0xcc   : >> { %v312_v47 = vadd.f32 %v310_v41, %v298_v37  ;;  %v601_v50 = vld [vmem:[%s834_s24 + $0x5] ss:$0 sm:$0xff]  ;;  %v352_v54 = vmul.f32 %v595_v46, %v591_v45  ;;  %v603_v59 = vld [vmem:[%s831_s23 + $0x6] sm:$0xff]  ;;  %v353_v9 = vmul.f32 %v595_v46, %v592_v62  ;;  %v604_v10 = vld [vmem:[%s831_s23 + $0xe] sm:$0xff] }
  0xcd   : >> { %v607_v60 = vld [vmem:[%s834_s24 + $0x6] ss:$0 sm:$0xff]  ;;  %v366_v0 = vmul.f32 %v601_v50, %v597_v49  ;;  %v313_v1 = vadd.f32 %v311_v56, %v299_v55  ;;  %v609_v3 = vld [vmem:[%s831_s23 + $0x7] sm:$0xff]  ;;  %v367_v14 = vmul.f32 %v601_v50, %v598_v5  ;;  %v610_v15 = vld [vmem:[%s831_s23 + $0xf] sm:$0xff] }
  0xce   : >> { %v326_v53 = vadd.f32 %v324_v42, %v312_v47  ;;  %v613_v4 = vld [vmem:[%s834_s24 + $0x7] ss:$0 sm:$0xff]  ;;  %v380_v7 = vmul.f32 %v607_v60, %v603_v59  ;;  %v381_v18 = vmul.f32 %v607_v60, %v604_v10 }
  0xcf   : >> { %v327_v8 = vadd.f32 %v325_v61, %v313_v1  ;;  %v394_v12 = vmul.f32 %v613_v4, %v609_v3  ;;  %v395_v22 = vmul.f32 %v613_v4, %v610_v15 }
  0xd0   : >> { %v340_v63 = vadd.f32 %v338_v48, %v326_v53 }
  0xd1   : >> { %v341_v13 = vadd.f32 %v339_v2, %v327_v8 }
  0xd2   : >> { %v354_v6 = vadd.f32 %v352_v54, %v340_v63 }
  0xd3   : >> { %v355_v17 = vadd.f32 %v353_v9, %v341_v13 }
  0xd4   : >> { %v368_v11 = vadd.f32 %v366_v0, %v354_v6 }
  0xd5   : >> { %v369_v21 = vadd.f32 %v367_v14, %v355_v17 }
  0xd6   : >> { %v382_v16 = vadd.f32 %v380_v7, %v368_v11 }
  0xd7   : >> { %v383_v24 = vadd.f32 %v381_v18, %v369_v21  ;;  %286 = sbr.rel (!%p284_p2) target bundleno = 195 (0xc3), region = 90 }
  0xd8   : >> { %v396_v20 = vadd.f32 %v394_v12, %v382_v16 }
  0xd9   : >> { %v397_v26 = vadd.f32 %v395_v22, %v383_v24 }
  0xda   : >> { %v400_v23 = vadd.f32 %v398_v19, %v396_v20 }
  0xdb   : >> { %v401_v27 = vadd.f32 %v399_v25, %v397_v26 }
  0xdc   : >> { %402 = vst.msk [vmem:[%s815_s21] sm:$0xff] %vm266_vm0, %v400_v23 }
  0xdd   : >> { %403 = vst.msk [vmem:[%s815_s21 + $0x8] sm:$0xff] %vm266_vm0, %v401_v27 }
  0xe3   : > { %v404_v28 = vld [vmem:[%s815_s21] sm:$0xff] }
  0xe4   : > { %v405_v30 = vld [vmem:[%s815_s21 + $0x8] sm:$0xff]  ;;  %v407_v31 = vadd.f32 %v406_v29, %v404_v28 }
  0xe5   : > { %v408_v32 = vadd.f32 %v406_v29, %v405_v30 }
  0xe6   : > { %409 = vst.msk [vmem:[%s815_s21] sm:$0xff] %vm266_vm0, %v407_v31 }
  0xe7   : > { %410 = vst.msk [vmem:[%s815_s21 + $0x8] sm:$0xff] %vm266_vm0, %v408_v32 }
  0xe8 PF: > { %s14_s14 = sadd.s32 1, %s716_s14   ;;  %s890_s12 = smov %s712_s13 }
  0xe9   : > { %p11_p3 = scmp.ge.s32.totalorder %s14_s14, 6   ;;  %s891_s13 = smov %s893_s16 }
  0xeb   :  { %13 = sbr.rel (!%p11_p3) target bundleno = 2 (0x2), region = 101 }
  0xf2   :  { %438 = vsyncpa [#allocation5], 1 }
  0xf3   :  { %440 = vsyncpa [#allocation5 + $0x1], 1 }

</bundles_post_ra>
